<compile_context>
chip_gen: v7x
topology: tpu7x:2x2x1
jax: 0.10.0
libtpu: 0.0.40
codegen_flags: <defaults>
</compile_context>

<pallas_src>
import functools

import jax
import jax.numpy as jnp
import numpy as np
from jax.experimental import pallas as pl
from jax.experimental.pallas import tpu as pltpu


def _round_up(v, m):
    return ((v + m - 1) // m) * m


# ---------------------------------------------------------------------------
# Fused inverted-residual kernel: one batch-block (NB images) per grid step.
# ---------------------------------------------------------------------------
def _fused_block_kernel(x_ref, w1_ref, b1_ref, mw_ref, b2_ref, w2_ref, b3_ref,
                        *rest, W, L, stride, use_residual):
    """All operands live in VMEM; layout is (channels, NB*H*W) = lane-dense.

    x_ref : (cin_p, L)        input slab, L = NB*H*W lanes
    w1_ref: (hid_p, cin_p)    1x1 expand weight (BN scale folded)
    b1_ref: (hid_p, 1)        expand bias
    mw_ref: (9, hid_p, L)     depthwise tap weights pre-multiplied with the
                              per-lane zero-padding mask, k = ky*3+kx
    b2_ref: (hid_p, 1)        depthwise bias
    w2_ref: (oup_p, hid_p)    1x1 project weight (BN scale folded)
    b3_ref: (oup_p, 1)        project bias
    rest  : (sel_ref, o_ref) when stride>1 else (o_ref,)
            sel_ref: (L, Lo)  block-diagonal 0/1 stride-subsample matrix
            o_ref  : (oup_p, Lo)
    """
    if stride > 1:
        sel_ref, o_ref = rest
    else:
        (o_ref,) = rest

    f32 = jnp.float32
    hp = jax.lax.Precision.HIGHEST  # MXU is idle here; full-f32 passes are free
    cdt = w1_ref.dtype              # compute dtype for MXU operands (f32/bf16)

    x = x_ref[...]

    # ---- 1) 1x1 expand + bias + ReLU : MXU ----------------------------------
    h = jnp.dot(w1_ref[...], x.astype(cdt),
                preferred_element_type=f32, precision=hp)
    h = jnp.maximum(h + b1_ref[...], 0.0)             # (hid_p, L) f32

    # ---- 2) 3x3 depthwise + bias + ReLU : XLU rolls + VPU FMAs --------------
    # Each tap is a circular lane rotation of h; positions whose source lies
    # outside their own image (zero padding / batch boundary) have the mask
    # pre-folded into mw, so wrap-around reads contribute exactly 0.
    dw = jnp.zeros_like(h)
    for ky in range(3):
        for kx in range(3):
            k = ky * 3 + kx
            d = (ky - 1) * W + (kx - 1)               # flat tap offset
            src = h if d == 0 else pltpu.roll(h, shift=(-d) % L, axis=1)
            dw = dw + mw_ref[k] * src
    dw = jnp.maximum(dw + b2_ref[...], 0.0)           # (hid_p, L) f32

    # ---- 3) stride-s subsample via one-hot selection matmul : MXU -----------
    dwc = dw.astype(cdt)
    if stride > 1:
        dwc = jnp.dot(dwc, sel_ref[...].astype(cdt),
                      preferred_element_type=f32, precision=hp).astype(cdt)

    # ---- 4) 1x1 project + bias (+ fused residual) : MXU ---------------------
    out = jnp.dot(w2_ref[...], dwc, preferred_element_type=f32, precision=hp)
    out = out + b3_ref[...]
    if use_residual:
        out = out + x.astype(f32)
    o_ref[...] = out.astype(o_ref.dtype)


def fused_inverted_residual(xp, w1, b1, mw, b2, w2, b3, sel, *,
                            W, HW, HWo, NB, N, stride, use_residual):
    """xp: (cin_p, N*HW) -> (oup_p, N*HWo); NB images per grid step."""
    cin_p = xp.shape[0]
    hid_p = w1.shape[0]
    oup_p = w2.shape[0]
    L, Lo = NB * HW, NB * HWo
    G = N // NB

    kernel = functools.partial(_fused_block_kernel, W=W, L=L, stride=stride,
                               use_residual=use_residual)
    in_specs = [
        pl.BlockSpec((cin_p, L), lambda g: (0, g)),
        pl.BlockSpec((hid_p, cin_p), lambda g: (0, 0)),
        pl.BlockSpec((hid_p, 1), lambda g: (0, 0)),
        pl.BlockSpec((9, hid_p, L), lambda g: (0, 0, 0)),
        pl.BlockSpec((hid_p, 1), lambda g: (0, 0)),
        pl.BlockSpec((oup_p, hid_p), lambda g: (0, 0)),
        pl.BlockSpec((oup_p, 1), lambda g: (0, 0)),
    ]
    args = [xp, w1, b1, mw, b2, w2, b3]
    if stride > 1:
        in_specs.append(pl.BlockSpec((L, Lo), lambda g: (0, 0)))
        args.append(sel)

    return pl.pallas_call(
        kernel,
        grid=(G,),
        in_specs=in_specs,
        out_specs=pl.BlockSpec((oup_p, Lo), lambda g: (0, g)),
        out_shape=jax.ShapeDtypeStruct((oup_p, N * HWo), jnp.float32),
        compiler_params=pltpu.CompilerParams(
            # Batch-blocked grid steps are independent -> "parallel" lets the
            # two v7x TensorCores split them; on v5e/v6e it is a plain loop.
            dimension_semantics=("parallel",)),
    )(*args)


# ---------------------------------------------------------------------------
# SingleOperation equivalent
# ---------------------------------------------------------------------------
class SingleOperationPallas:
    """Pallas version of SingleOperation with the sampled op = inverted-
    residual block.  layers_configs = [in_ch, out_ch, stride, fm_size]."""

    def __init__(self, layers_configs, expansion=2, key=jax.random.PRNGKey(0),
                 compute_dtype=jnp.float32):
        # compute_dtype: set jnp.bfloat16 on v6e/v7x to halve MXU-operand
        # bytes / vreg pressure; keep float32 on v5e (no bf16 VPU there).
        inp, oup, stride, fm = layers_configs
        hid = inp * expansion
        self.inp, self.oup, self.stride, self.hid = inp, oup, stride, hid
        self.compute_dtype = compute_dtype
        self.cin_p = _round_up(inp, 8)
        self.hid_p = _round_up(hid, 8)
        self.oup_p = _round_up(oup, 8)

        ks = jax.random.split(key, 9)
        f32 = jnp.float32
        # raw conv weights / eval-mode folded-BN affine (kept for the reference)
        self.w_expand = (0.3 * jax.random.normal(ks[0], (inp, hid))).astype(f32)
        self.w_dw = (0.3 * jax.random.normal(ks[1], (hid, 3, 3))).astype(f32)
        self.w_proj = (0.3 * jax.random.normal(ks[2], (hid, oup))).astype(f32)
        self.s1 = (1.0 + 0.1 * jax.random.normal(ks[3], (hid,))).astype(f32)
        self.b1 = (0.1 * jax.random.normal(ks[4], (hid,))).astype(f32)
        self.s2 = (1.0 + 0.1 * jax.random.normal(ks[5], (hid,))).astype(f32)
        self.b2 = (0.1 * jax.random.normal(ks[6], (hid,))).astype(f32)
        self.s3 = (1.0 + 0.1 * jax.random.normal(ks[7], (oup,))).astype(f32)
        self.b3 = (0.1 * jax.random.normal(ks[8], (oup,))).astype(f32)

        # Kernel-side params: BN scale folded into the weights; channel dims
        # zero-padded to multiples of 8 so every MXU operand is sublane-aligned
        # (padded rows/cols are zero => they contribute nothing).
        def pad2(a, r, c):
            return jnp.pad(a, ((0, r - a.shape[0]), (0, c - a.shape[1])))

        w1f = self.w_expand.T * self.s1[:, None]                  # (hid, inp)
        w2f = self.w_proj.T * self.s3[:, None]                    # (oup, hid)
        dwt9 = (self.w_dw * self.s2[:, None, None]).transpose(1, 2, 0)
        dwt9 = dwt9.reshape(9, hid)                               # k = ky*3+kx
        self.w1f = pad2(w1f, self.hid_p, self.cin_p).astype(f32)
        self.w2f = pad2(w2f, self.oup_p, self.hid_p).astype(f32)
        self.dwt9 = pad2(dwt9, 9, self.hid_p).astype(f32)
        self.b1k = pad2(self.b1.reshape(hid, 1), self.hid_p, 1)
        self.b2k = pad2(self.b2.reshape(hid, 1), self.hid_p, 1)
        self.b3k = pad2(self.b3.reshape(oup, 1), self.oup_p, 1)
        self._mw_cache = {}
        self._sel_cache = {}

    def _masked_taps(self, H, W, NB):
        """(9, hid_p, NB*H*W): tap weight x per-lane zero-padding mask."""
        key = (H, W, NB)
        if key not in self._mw_cache:
            hw = H * W
            row = np.arange(hw) // W
            col = np.arange(hw) % W
            m = np.zeros((9, hw), np.float32)
            for ky in range(3):
                for kx in range(3):
                    dy, dx = ky - 1, kx - 1
                    m[ky * 3 + kx] = ((row + dy >= 0) & (row + dy < H) &
                                      (col + dx >= 0) & (col + dx < W))
            m_tiled = jnp.asarray(np.tile(m, (1, NB)))            # (9, NB*HW)
            self._mw_cache[key] = (self.dwt9[:, :, None] *
                                   m_tiled[:, None, :]).astype(jnp.float32)
        return self._mw_cache[key]

    def _sel_matrix(self, H, W, NB, stride):
        """(NB*HW, NB*HWo) block-diagonal 0/1 stride-subsample matrix."""
        key = (H, W, NB, stride)
        if key not in self._sel_cache:
            Ho = (H - 1) // stride + 1
            Wo = (W - 1) // stride + 1
            s0 = np.zeros((H * W, Ho * Wo), np.float32)
            for oy in range(Ho):
                for ox in range(Wo):
                    s0[(oy * stride) * W + ox * stride, oy * Wo + ox] = 1.0
            # TODO(synk): the block-diagonal selector grows as NB^2; for very
            # large batch blocks switch to per-image selection / output-strided
            # tap offsets instead.
            sel = np.kron(np.eye(NB, dtype=np.float32), s0)
            self._sel_cache[key] = jnp.asarray(sel)
        return self._sel_cache[key]

    def __call__(self, x):
        # x: (N, Cin, H, W) float32, NCHW
        N, Cin, H, W = x.shape
        assert Cin == self.inp
        stride = self.stride
        Ho = (H - 1) // stride + 1
        Wo = (W - 1) // stride + 1
        HW, HWo = H * W, Ho * Wo
        use_res = (stride == 1 and self.inp == self.oup)

        # Batch block: as many images per grid step as divide N (<=8); fall
        # back to a single block if the lane extent would not be 128-aligned.
        NB = min(N, 8)
        while N % NB:
            NB -= 1
        if (NB * HW) % 128 and NB != N:
            NB = N

        cdt = self.compute_dtype
        # Wrapper-side layout plumbing only (reshape/transpose/pad, no compute).
        xt = jnp.transpose(x.reshape(N, Cin, HW), (1, 0, 2)).reshape(Cin, N * HW)
        xp = jnp.pad(xt, ((0, self.cin_p - Cin), (0, 0))).astype(cdt)
        sel = self._sel_matrix(H, W, NB, stride) if stride > 1 else None

        out_p = fused_inverted_residual(
            xp, self.w1f.astype(cdt), self.b1k, self._masked_taps(H, W, NB),
            self.b2k, self.w2f.astype(cdt), self.b3k, sel,
            W=W, HW=HW, HWo=HWo, NB=NB, N=N, stride=stride,
            use_residual=use_res)

        out = out_p[:self.oup].reshape(self.oup, N, Ho, Wo)
        return jnp.transpose(out, (1, 0, 2, 3))


# ---------------------------------------------------------------------------
# Pure-JAX reference (for correctness check)
# ---------------------------------------------------------------------------
def _reference(op, x):
    dn = ("NCHW", "OIHW", "NCHW")
    prec = jax.lax.Precision.HIGHEST
    w1 = jnp.transpose(op.w_expand)[:, :, None, None]            # (hid, inp, 1, 1)
    wd = op.w_dw[:, None, :, :]                                   # (hid, 1, 3, 3)
    w2 = jnp.transpose(op.w_proj)[:, :, None, None]               # (oup, hid, 1, 1)

    y = jax.lax.conv_general_dilated(x, w1, (1, 1), "VALID",
                                     dimension_numbers=dn, precision=prec)
    y = jnp.maximum(y * op.s1[None, :, None, None] + op.b1[None, :, None, None], 0.0)
    y = jax.lax.conv_general_dilated(y, wd, (op.stride, op.stride),
                                     ((1, 1), (1, 1)), dimension_numbers=dn,
                                     feature_group_count=op.hid, precision=prec)
    y = jnp.maximum(y * op.s2[None, :, None, None] + op.b2[None, :, None, None], 0.0)
    z = jax.lax.conv_general_dilated(y, w2, (1, 1), "VALID",
                                     dimension_numbers=dn, precision=prec)
    z = z * op.s3[None, :, None, None] + op.b3[None, :, None, None]
    if op.stride == 1 and op.inp == op.oup:
        z = z + x
    return z


# ---------------------------------------------------------------------------
if __name__ == "__main__":
    x = jax.random.normal(jax.random.PRNGKey(0), (2, 4, 16, 16), jnp.float32)

    # stride=1, in==out (residual) configuration
    op1 = SingleOperationPallas([4, 4, 1, 16], expansion=2,
                                key=jax.random.PRNGKey(42))
    out1 = jax.block_until_ready(op1(x))
    ref1 = jax.block_until_ready(_reference(op1, x))
    np.testing.assert_allclose(np.asarray(out1), np.asarray(ref1),
                               rtol=2e-3, atol=2e-3)

    # stride=2, non-residual configuration (exercises the MXU subsample path)
    op2 = SingleOperationPallas([4, 8, 2, 16], expansion=2,
                                key=jax.random.PRNGKey(7))
    out2 = jax.block_until_ready(op2(x))
    ref2 = jax.block_until_ready(_reference(op2, x))
    np.testing.assert_allclose(np.asarray(out2), np.asarray(ref2),
                               rtol=2e-3, atol=2e-3)

    print("KERNEL_OK")
</pallas_src>

<mosaic_0001>
module attributes {stable_mosaic.version = 11 : i64} {
  func.func @_fused_block_kernel(%arg0: i32, %arg1: memref<8x512xf32, #tpu.memory_space<vmem>>, %arg2: memref<8x8xf32, #tpu.memory_space<vmem>>, %arg3: memref<8x1xf32, #tpu.memory_space<vmem>>, %arg4: memref<9x8x512xf32, #tpu.memory_space<vmem>>, %arg5: memref<8x1xf32, #tpu.memory_space<vmem>>, %arg6: memref<8x8xf32, #tpu.memory_space<vmem>>, %arg7: memref<8x1xf32, #tpu.memory_space<vmem>>, %arg8: memref<8x512xf32, #tpu.memory_space<vmem>>) attributes {dimension_semantics = [#tpu.dimension_semantics<parallel>], iteration_bounds = array<i64: 1>, scalar_prefetch = 0 : i64, scratch_operands = 0 : i64, tpu.core_type = #tpu.core_type<tc>, window_params = [{transform_indices = @transform_0, window_bounds = array<i64: 8, 512>}, {pipeline_mode = #tpu.pipeline_mode<synchronous>, transform_indices = @transform_1, window_bounds = array<i64: 8, 8>}, {pipeline_mode = #tpu.pipeline_mode<synchronous>, transform_indices = @transform_2, window_bounds = array<i64: 8, 1>}, {pipeline_mode = #tpu.pipeline_mode<synchronous>, transform_indices = @transform_3, window_bounds = array<i64: 9, 8, 512>}, {pipeline_mode = #tpu.pipeline_mode<synchronous>, transform_indices = @transform_4, window_bounds = array<i64: 8, 1>}, {pipeline_mode = #tpu.pipeline_mode<synchronous>, transform_indices = @transform_5, window_bounds = array<i64: 8, 8>}, {pipeline_mode = #tpu.pipeline_mode<synchronous>, transform_indices = @transform_6, window_bounds = array<i64: 8, 1>}, {transform_indices = @transform_7, window_bounds = array<i64: 8, 512>}]} {
    %c0 = arith.constant 0 : index
    %c0_0 = arith.constant 0 : index
    %0 = vector.load %arg1[%c0, %c0_0] : memref<8x512xf32, #tpu.memory_space<vmem>>, vector<8x512xf32>
    %c0_1 = arith.constant 0 : index
    %c0_2 = arith.constant 0 : index
    %1 = vector.load %arg2[%c0_1, %c0_2] : memref<8x8xf32, #tpu.memory_space<vmem>>, vector<8x8xf32>
    %cst = arith.constant dense<0.000000e+00> : vector<8x512xf32>
    %2 = tpu.matmul %1, %0, %cst {dimension_numbers = #tpu.dot_dimension_numbers<[1], [0], [0], [1], [0, 0, 1, 1], [], []>, precision = #tpu.contract_precision<fp32>} : vector<8x8xf32>, vector<8x512xf32>, vector<8x512xf32> -> vector<8x512xf32>
    %c0_3 = arith.constant 0 : index
    %c0_4 = arith.constant 0 : index
    %3 = vector.load %arg3[%c0_3, %c0_4] : memref<8x1xf32, #tpu.memory_space<vmem>>, vector<8x1xf32>
    %4 = vector.broadcast %3 : vector<8x1xf32> to vector<8x512xf32>
    %5 = arith.addf %2, %4 : vector<8x512xf32>
    %cst_5 = arith.constant 0.000000e+00 : f32
    %6 = vector.broadcast %cst_5 : f32 to vector<8x512xf32>
    %7 = arith.maximumf %5, %6 : vector<8x512xf32>
    %cst_6 = arith.constant 0.000000e+00 : f32
    %8 = vector.broadcast %cst_6 : f32 to vector<8x512xf32>
    %c17_i32 = arith.constant 17 : i32
    %9 = tpu.dynamic_rotate %7 by %c17_i32 dim 1 : vector<8x512xf32>, i32 -> vector<8x512xf32>
    %c0_7 = arith.constant 0 : index
    %c0_8 = arith.constant 0 : index
    %c0_9 = arith.constant 0 : index
    %10 = vector.load %arg4[%c0_7, %c0_8, %c0_9] : memref<9x8x512xf32, #tpu.memory_space<vmem>>, vector<1x8x512xf32>
    %11 = vector.shape_cast %10 : vector<1x8x512xf32> to vector<8x512xf32>
    %12 = arith.mulf %11, %9 : vector<8x512xf32>
    %13 = arith.addf %8, %12 : vector<8x512xf32>
    %c16_i32 = arith.constant 16 : i32
    %14 = tpu.dynamic_rotate %7 by %c16_i32 dim 1 : vector<8x512xf32>, i32 -> vector<8x512xf32>
    %c1 = arith.constant 1 : index
    %c0_10 = arith.constant 0 : index
    %c0_11 = arith.constant 0 : index
    %15 = vector.load %arg4[%c1, %c0_10, %c0_11] : memref<9x8x512xf32, #tpu.memory_space<vmem>>, vector<1x8x512xf32>
    %16 = vector.shape_cast %15 : vector<1x8x512xf32> to vector<8x512xf32>
    %17 = arith.mulf %16, %14 : vector<8x512xf32>
    %18 = arith.addf %13, %17 : vector<8x512xf32>
    %c15_i32 = arith.constant 15 : i32
    %19 = tpu.dynamic_rotate %7 by %c15_i32 dim 1 : vector<8x512xf32>, i32 -> vector<8x512xf32>
    %c2 = arith.constant 2 : index
    %c0_12 = arith.constant 0 : index
    %c0_13 = arith.constant 0 : index
    %20 = vector.load %arg4[%c2, %c0_12, %c0_13] : memref<9x8x512xf32, #tpu.memory_space<vmem>>, vector<1x8x512xf32>
    %21 = vector.shape_cast %20 : vector<1x8x512xf32> to vector<8x512xf32>
    %22 = arith.mulf %21, %19 : vector<8x512xf32>
    %23 = arith.addf %18, %22 : vector<8x512xf32>
    %c1_i32 = arith.constant 1 : i32
    %24 = tpu.dynamic_rotate %7 by %c1_i32 dim 1 : vector<8x512xf32>, i32 -> vector<8x512xf32>
    %c3 = arith.constant 3 : index
    %c0_14 = arith.constant 0 : index
    %c0_15 = arith.constant 0 : index
    %25 = vector.load %arg4[%c3, %c0_14, %c0_15] : memref<9x8x512xf32, #tpu.memory_space<vmem>>, vector<1x8x512xf32>
    %26 = vector.shape_cast %25 : vector<1x8x512xf32> to vector<8x512xf32>
    %27 = arith.mulf %26, %24 : vector<8x512xf32>
    %28 = arith.addf %23, %27 : vector<8x512xf32>
    %c4 = arith.constant 4 : index
    %c0_16 = arith.constant 0 : index
    %c0_17 = arith.constant 0 : index
    %29 = vector.load %arg4[%c4, %c0_16, %c0_17] : memref<9x8x512xf32, #tpu.memory_space<vmem>>, vector<1x8x512xf32>
    %30 = vector.shape_cast %29 : vector<1x8x512xf32> to vector<8x512xf32>
    %31 = arith.mulf %30, %7 : vector<8x512xf32>
    %32 = arith.addf %28, %31 : vector<8x512xf32>
    %c511_i32 = arith.constant 511 : i32
    %33 = tpu.dynamic_rotate %7 by %c511_i32 dim 1 : vector<8x512xf32>, i32 -> vector<8x512xf32>
    %c5 = arith.constant 5 : index
    %c0_18 = arith.constant 0 : index
    %c0_19 = arith.constant 0 : index
    %34 = vector.load %arg4[%c5, %c0_18, %c0_19] : memref<9x8x512xf32, #tpu.memory_space<vmem>>, vector<1x8x512xf32>
    %35 = vector.shape_cast %34 : vector<1x8x512xf32> to vector<8x512xf32>
    %36 = arith.mulf %35, %33 : vector<8x512xf32>
    %37 = arith.addf %32, %36 : vector<8x512xf32>
    %c497_i32 = arith.constant 497 : i32
    %38 = tpu.dynamic_rotate %7 by %c497_i32 dim 1 : vector<8x512xf32>, i32 -> vector<8x512xf32>
    %c6 = arith.constant 6 : index
    %c0_20 = arith.constant 0 : index
    %c0_21 = arith.constant 0 : index
    %39 = vector.load %arg4[%c6, %c0_20, %c0_21] : memref<9x8x512xf32, #tpu.memory_space<vmem>>, vector<1x8x512xf32>
    %40 = vector.shape_cast %39 : vector<1x8x512xf32> to vector<8x512xf32>
    %41 = arith.mulf %40, %38 : vector<8x512xf32>
    %42 = arith.addf %37, %41 : vector<8x512xf32>
    %c496_i32 = arith.constant 496 : i32
    %43 = tpu.dynamic_rotate %7 by %c496_i32 dim 1 : vector<8x512xf32>, i32 -> vector<8x512xf32>
    %c7 = arith.constant 7 : index
    %c0_22 = arith.constant 0 : index
    %c0_23 = arith.constant 0 : index
    %44 = vector.load %arg4[%c7, %c0_22, %c0_23] : memref<9x8x512xf32, #tpu.memory_space<vmem>>, vector<1x8x512xf32>
    %45 = vector.shape_cast %44 : vector<1x8x512xf32> to vector<8x512xf32>
    %46 = arith.mulf %45, %43 : vector<8x512xf32>
    %47 = arith.addf %42, %46 : vector<8x512xf32>
    %c495_i32 = arith.constant 495 : i32
    %48 = tpu.dynamic_rotate %7 by %c495_i32 dim 1 : vector<8x512xf32>, i32 -> vector<8x512xf32>
    %c8 = arith.constant 8 : index
    %c0_24 = arith.constant 0 : index
    %c0_25 = arith.constant 0 : index
    %49 = vector.load %arg4[%c8, %c0_24, %c0_25] : memref<9x8x512xf32, #tpu.memory_space<vmem>>, vector<1x8x512xf32>
    %50 = vector.shape_cast %49 : vector<1x8x512xf32> to vector<8x512xf32>
    %51 = arith.mulf %50, %48 : vector<8x512xf32>
    %52 = arith.addf %47, %51 : vector<8x512xf32>
    %c0_26 = arith.constant 0 : index
    %c0_27 = arith.constant 0 : index
    %53 = vector.load %arg5[%c0_26, %c0_27] : memref<8x1xf32, #tpu.memory_space<vmem>>, vector<8x1xf32>
    %54 = vector.broadcast %53 : vector<8x1xf32> to vector<8x512xf32>
    %55 = arith.addf %52, %54 : vector<8x512xf32>
    %cst_28 = arith.constant 0.000000e+00 : f32
    %56 = vector.broadcast %cst_28 : f32 to vector<8x512xf32>
    %57 = arith.maximumf %55, %56 : vector<8x512xf32>
    %c0_29 = arith.constant 0 : index
    %c0_30 = arith.constant 0 : index
    %58 = vector.load %arg6[%c0_29, %c0_30] : memref<8x8xf32, #tpu.memory_space<vmem>>, vector<8x8xf32>
    %cst_31 = arith.constant dense<0.000000e+00> : vector<8x512xf32>
    %59 = tpu.matmul %58, %57, %cst_31 {dimension_numbers = #tpu.dot_dimension_numbers<[1], [0], [0], [1], [0, 0, 1, 1], [], []>, precision = #tpu.contract_precision<fp32>} : vector<8x8xf32>, vector<8x512xf32>, vector<8x512xf32> -> vector<8x512xf32>
    %c0_32 = arith.constant 0 : index
    %c0_33 = arith.constant 0 : index
    %60 = vector.load %arg7[%c0_32, %c0_33] : memref<8x1xf32, #tpu.memory_space<vmem>>, vector<8x1xf32>
    %61 = vector.broadcast %60 : vector<8x1xf32> to vector<8x512xf32>
    %62 = arith.addf %59, %61 : vector<8x512xf32>
    %63 = arith.addf %62, %0 : vector<8x512xf32>
    %c0_34 = arith.constant 0 : index
    %c0_35 = arith.constant 0 : index
    %64 = vector.load %arg8[%c0_34, %c0_35] : memref<8x512xf32, #tpu.memory_space<vmem>>, vector<8x512xf32>
    tpu.vector_store %arg8[%c0_34, %c0_35], %63 {strides = array<i32>} : memref<8x512xf32, #tpu.memory_space<vmem>>, vector<8x512xf32>,
    return
  }
  func.func @transform_0(%arg0: i32) -> (i32, i32) {
    %c0_i32 = arith.constant 0 : i32
    %c0_i32_0 = arith.constant 0 : i32
    return %c0_i32, %arg0 : i32, i32
  }
  func.func @transform_1(%arg0: i32) -> (i32, i32) {
    %c0_i32 = arith.constant 0 : i32
    %c0_i32_0 = arith.constant 0 : i32
    %c0_i32_1 = arith.constant 0 : i32
    return %c0_i32, %c0_i32_0 : i32, i32
  }
  func.func @transform_2(%arg0: i32) -> (i32, i32) {
    %c0_i32 = arith.constant 0 : i32
    %c0_i32_0 = arith.constant 0 : i32
    %c0_i32_1 = arith.constant 0 : i32
    return %c0_i32, %c0_i32_0 : i32, i32
  }
  func.func @transform_3(%arg0: i32) -> (i32, i32, i32) {
    %c0_i32 = arith.constant 0 : i32
    %c0_i32_0 = arith.constant 0 : i32
    %c0_i32_1 = arith.constant 0 : i32
    %c0_i32_2 = arith.constant 0 : i32
    return %c0_i32, %c0_i32_0, %c0_i32_1 : i32, i32, i32
  }
  func.func @transform_4(%arg0: i32) -> (i32, i32) {
    %c0_i32 = arith.constant 0 : i32
    %c0_i32_0 = arith.constant 0 : i32
    %c0_i32_1 = arith.constant 0 : i32
    return %c0_i32, %c0_i32_0 : i32, i32
  }
  func.func @transform_5(%arg0: i32) -> (i32, i32) {
    %c0_i32 = arith.constant 0 : i32
    %c0_i32_0 = arith.constant 0 : i32
    %c0_i32_1 = arith.constant 0 : i32
    return %c0_i32, %c0_i32_0 : i32, i32
  }
  func.func @transform_6(%arg0: i32) -> (i32, i32) {
    %c0_i32 = arith.constant 0 : i32
    %c0_i32_0 = arith.constant 0 : i32
    %c0_i32_1 = arith.constant 0 : i32
    return %c0_i32, %c0_i32_0 : i32, i32
  }
  func.func @transform_7(%arg0: i32) -> (i32, i32) {
    %c0_i32 = arith.constant 0 : i32
    %c0_i32_0 = arith.constant 0 : i32
    return %c0_i32, %arg0 : i32, i32
  }
}

</mosaic_0001>

<bundles_post_ra>
// kernel: tpu_custom_call.1
= control target key start
LH: loop header
LB: loop body
LE: loop exit
PB: predicated region body
PF: predicated region fallthrough
CT: control target
= control target key end

     0   :  { %12 = vsyncpa [#allocation3], 0  ;;  %s2733_s0 = inlined_call_operand.hbm [shape: f32[8,512], index: 0, kind: input, shape index: {}]   ;;  %s2734_s1 = inlined_call_operand.vmem [shape: f32[8,8], index: 1, kind: input, shape index: {}]   ;;  %s2735_s2 = inlined_call_operand.vmem [shape: f32[8,1], index: 2, kind: input, shape index: {}]   ;;  %s2736_s3 = inlined_call_operand.hbm [shape: f32[9,8,512], index: 3, kind: input, shape index: {}]   ;;  %s2737_s4 = inlined_call_operand.vmem [shape: f32[8,1], index: 4, kind: input, shape index: {}]   ;;  %s2738_s5 = inlined_call_operand.vmem [shape: f32[8,8], index: 5, kind: input, shape index: {}]   ;;  %s2739_s6 = inlined_call_operand.vmem [shape: f32[8,1], index: 6, kind: input, shape index: {}]   ;;  %s2740_s7 = inlined_call_operand.hbm [shape: f32[8,512], index: 7, kind: output, shape index: {}]  }
   0x1   :  { %13 = vsyncpa [#allocation6], 0 }
   0x2   :  { %14 = vsyncpa [#allocation4], 0  ;;  %s2339_s24 = smov [#allocation2]   ;;  %s2340_s26 = smov [#allocation5]  }
   0x3   :  { %s21_s25 = sshll.u32 %s2339_s24, 4  ;;  %s34_s27 = sshll.u32 %s2340_s26, 4  ;;  %s22_s25 = int_to_ptr.vmem [resolvable:$true] %s21_s25  ;;  %s2394_s27 = int_to_ptr.vmem [resolvable:$true] %s34_s27 }
   0x4   :  { %s2267_s30 = scalar_lea.hbm %s2733_s0, 512 }
   0x5   :  { %p2268_p0 = scmp.ne.s32.totalorder %s2733_s0, %s2267_s30  ;;  %p2271_p1 = scmp.lt.u32.totalorder %s2267_s30, %s2733_s0 }
   0x7   :  { %p2273_p2 = pnand %p2271_p1, %p2268_p0 }
   0x9   :  { %2276 = shalt.err (!%p2273_p2)
}
   0xa   :  { %s2277_s12 = scalar_lea.vmem %s22_s25, 512  ;;  %p2282_p4 = scmp.lt.s32.totalorder %s22_s25, %s22_s25 }
   0xb   :  { %p2278_p3 = scmp.ne.s32.totalorder %s22_s25, %s2277_s12  ;;  %p2283_p5 = scmp.lt.s32.totalorder %s2277_s12, %s2277_s12 }
   0xd   :  { %p2284_p6 = por %p2283_p5, %p2282_p4 }
   0xf   :  { %p2285_p7 = pnand %p2284_p6, %p2278_p3 }
  0x11   :  { %2288 = shalt.err (!%p2285_p7)
}
  0x12   :  { %24 = dma.hbm_to_vmem [thread:$0]  %s2733_s0, 512, %s22_s25, [#allocation3]  }
  0x13   :  { %s2289_s17 = scalar_lea.hbm %s2736_s3, 4608 }
  0x14   :  { %p2290_p8 = scmp.ne.s32.totalorder %s2736_s3, %s2289_s17  ;;  %p2293_p9 = scmp.lt.u32.totalorder %s2289_s17, %s2736_s3 }
  0x16   :  { %p2295_p10 = pnand %p2293_p9, %p2290_p8 }
  0x18   :  { %2298 = shalt.err (!%p2295_p10)
}
  0x19   :  { %s2299_s22 = scalar_lea.vmem %s2394_s27, 4608  ;;  %p2304_p12 = scmp.lt.s32.totalorder %s2394_s27, %s2394_s27 }
  0x1a   :  { %p2300_p11 = scmp.ne.s32.totalorder %s2394_s27, %s2299_s22  ;;  %p2305_p13 = scmp.lt.s32.totalorder %s2299_s22, %s2299_s22 }
  0x1c   :  { %p2306_p0 = por %p2305_p13, %p2304_p12 }
  0x1e   :  { %p2307_p1 = pnand %p2306_p0, %p2300_p11 }
  0x20   :  { %2310 = shalt.err (!%p2307_p1)
}
  0x21   :  { %s2341_s0 = smov 512   ;;  %s2342_s23 = smov 32  }
  0x22   :  { %40 = dma.hbm_to_vmem [thread:$0]  %s2736_s3, 4608, %s2394_s27, [#allocation6], %s2341_s0, %s2341_s0, %s2342_s23  }
  0x23   :  { %2333 = dma.done.wait [#allocation3], 512  }
  0x24   :  { %2334 = vsyncadd [#allocation3], 4294966784 }
  0x25   :  { %2335 = dma.done.wait [#allocation6], 4608  }
  0x26   :  { %2336 = vsyncadd [#allocation6], 4294962688  ;;  %v2343_v0 = vmov 0.0   ;;  %v2344_v1 = vmov 0   ;;  %vm64_vm0 = vcmask 64512   ;;  %v2427_v2 = vld [vmem:[#allocation2 + $0x8] sm:$0xff] }
  0x27   :  { %134 = vmatprep.mubr.f32.mxu0 %v2343_v0  ;;  %599 = vmatprep.mubr.f32.mxu1 %v2343_v0  ;;  %v2429_v3 = vld [vmem:[#allocation2 + $0x18] sm:$0xff]  ;;  %v2431_v4 = vld [vmem:[#allocation2] sm:$0xff]  ;;  %v2434_v5 = vand.u32 4294901760, %v2427_v2  ;;  %v2442_v8 = vld [vmem:[#allocation2 + $0x10] sm:$0xff]  ;;  %s2347_s29 = smov 111   ;;  %s2348_s30 = smov 15  }
  0x28   :  { %2265 = vset.pattern.permute.xlu0 %v2344_v1  ;;  %2266 = vset.pattern.permute.xlu1 %v2344_v1  ;;  %v2437_v6 = vand.u32 4294901760, %v2429_v3  ;;  %v2440_v7 = vand.u32 4294901760, %v2431_v4  ;;  %v57_v9 = vld [vmem:[%s2734_s1] sm:$0xff]  ;;  %v2448_v10 = vand.u32 4294901760, %v2442_v8  ;;  %s2345_s1 = smov 17   ;;  %s2349_s8 = smov 1  }
  0x29   :  { %v66_v11 = vsel %vm64_vm0, %v57_v9, 0  ;;  %v58_v12 = vld [vmem:[%s2735_s2] sm:$0xff]  ;;  %69 = vmatprep.subr.mxu0 %v2434_v5  ;;  %v147_v15 = vsub.f32 %v2427_v2, %v2434_v5  ;;  %s2346_s2 = smov 16   ;;  %s2350_s9 = smov 127  }
  0x2a   :  { %534 = vmatprep.subr.mxu1 %v2437_v6  ;;  %v153_v13 = vsub.f32 %v2431_v4, %v2440_v7  ;;  %v2458_v14 = vand.u32 4294901760, %v66_v11  ;;  %71 = vmatpush1.msra.mxu0 %v2440_v7  ;;  %v618_v16 = vsub.f32 %v2442_v8, %v2448_v10  ;;  %v612_v17 = vsub.f32 %v2429_v3, %v2437_v6  ;;  %s2351_s10 = smov 113   ;;  %s2352_s11 = smov 112   ;;  %v1224_v47 = vld [vmem:[%s2737_s4] sm:$0xff] }
  0x2b   :  { %536 = vmatpush1.msra.mxu1 %v2448_v10  ;;  %v148_v19 = vand.u32 4294901760, %v147_v15  ;;  %61 = vperm.xlu0 %2265, %v58_v12   ;;  %v1239_v48 = vld [vmem:[%s2739_s6] sm:$0xff] }
  0x2c   :  { %v136_v18 = vsub.f32 %v66_v11, %v2458_v14  ;;  %v154_v20 = vand.u32 4294901760, %v153_v13  ;;  %v613_v21 = vand.u32 4294901760, %v612_v17  ;;  %v619_v22 = vand.u32 4294901760, %v618_v16 }
  0x2d   :  { %v149_v24 = vsub.f32 %v147_v15, %v148_v19 }
  0x2e   :  { %v137_v23 = vand.u32 4294901760, %v136_v18  ;;  %v155_v25 = vsub.f32 %v153_v13, %v154_v20  ;;  %v614_v26 = vsub.f32 %v612_v17, %v613_v21  ;;  %v620_v27 = vsub.f32 %v618_v16, %v619_v22 }
  0x2f   :  { %v150_v29 = vand.u32 4294901760, %v149_v24 }
  0x30   :  { %v138_v28 = vsub.f32 %v136_v18, %v137_v23  ;;  %v615_v30 = vand.u32 4294901760, %v614_v26  ;;  %v156_v31 = vand.u32 4294901760, %v155_v25  ;;  %v621_v33 = vand.u32 4294901760, %v620_v27  ;;  %v1070_v26 = vld [vmem:[#allocation5 + $0x48] sm:$0xff] }
  0x31   :  { %151 = vmatprep.subr.mxu0 %v150_v29 }
  0x32   :  { %v139_v32 = vand.u32 4294901760, %v138_v28  ;;  %616 = vmatprep.subr.mxu1 %v615_v30 }
  0x34   :  { %140 = vmatmul.mubr.f32.vlgmr.msra.gmra.mrb[0].mxu0 %v139_v32  ;;  %605 = vmatmul.mubr.f32.vlgmr.msra.gmra.mrb[0].mxu1 %v139_v32 }
  0x35   :  { %157 = vmatpush1.msra.mxu0 %v156_v31  ;;  %220 = vmatprep.mubr.f32.mxu0 %v2343_v0  ;;  %v1043_v31 = vld [vmem:[#allocation5 + $0x20] sm:$0xff] }
  0x36   :  { %622 = vmatpush1.msra.mxu1 %v621_v33  ;;  %685 = vmatprep.mubr.f32.mxu1 %v2343_v0 }
  0x37   :  { %230 = vmatprep.subr.mxu0 %v147_v15  ;;  %695 = vmatprep.subr.mxu1 %v612_v17  ;;  %v1044_v15 = vld [vmem:[#allocation5 + $0x28] sm:$0xff] }
  0x38   :  { %v1018_v17 = vld [vmem:[#allocation5 + $0x8] sm:$0xff] }
  0x3c   :  { %222 = vmatmul.mubr.f32.vlgmr.msra.gmra.mrb[0].mxu0 %v2458_v14  ;;  %687 = vmatmul.mubr.f32.vlgmr.msra.gmra.mrb[0].mxu1 %v2458_v14 }
  0x3d   :  { %233 = vmatpush1.msra.mxu0 %v153_v13  ;;  %296 = vmatprep.mubr.f32.mxu0 %v2343_v0 }
  0x3e   :  { %698 = vmatpush1.msra.mxu1 %v618_v16  ;;  %761 = vmatprep.mubr.f32.mxu1 %v2343_v0 }
  0x3f   :  { %306 = vmatprep.subr.mxu0 %v2434_v5  ;;  %771 = vmatprep.subr.mxu1 %v2437_v6 }
  0x44   :  { %299 = vmatmul.mubr.f32.vlgmr.msra.gmra.mrb[0].mxu0 %v136_v18  ;;  %764 = vmatmul.mubr.f32.vlgmr.msra.gmra.mrb[0].mxu1 %v136_v18  ;;  %v1019_v18 = vld [vmem:[#allocation5 + $0x10] sm:$0xff] }
  0x45   :  { %308 = vmatpush1.msra.mxu0 %v2440_v7  ;;  %371 = vmatprep.mubr.f32.mxu0 %v2343_v0 }
  0x46   :  { %773 = vmatpush1.msra.mxu1 %v2448_v10  ;;  %836 = vmatprep.mubr.f32.mxu1 %v2343_v0 }
  0x47   :  { %384 = vmatprep.subr.mxu0 %v148_v19  ;;  %849 = vmatprep.subr.mxu1 %v613_v21 }
  0x4c   :  { %375 = vmatmul.mubr.f32.vlgmr.msra.gmra.mrb[0].mxu0 %v137_v23  ;;  %840 = vmatmul.mubr.f32.vlgmr.msra.gmra.mrb[0].mxu1 %v137_v23 }
  0x4d   :  { %388 = vmatpush1.msra.mxu0 %v154_v20  ;;  %451 = vmatprep.mubr.f32.mxu0 %v2343_v0  ;;  %v1045_v20 = vld [vmem:[#allocation5 + $0x30] sm:$0xff] }
  0x4e   :  { %853 = vmatpush1.msra.mxu1 %v619_v22  ;;  %916 = vmatprep.mubr.f32.mxu1 %v2343_v0 }
  0x4f   :  { %460 = vmatprep.subr.mxu0 %v2434_v5  ;;  %925 = vmatprep.subr.mxu1 %v2437_v6 }
  0x54   :  { %453 = vmatmul.mubr.f32.vlgmr.msra.gmra.mrb[0].mxu0 %v2458_v14  ;;  %918 = vmatmul.mubr.f32.vlgmr.msra.gmra.mrb[0].mxu1 %v2458_v14 }
  0x55   :  { %462 = vmatpush1.msra.mxu0 %v2440_v7  ;;  %525 = vmatprep.mubr.f32.mxu0 %v2343_v0 }
  0x56   :  { %927 = vmatpush1.msra.mxu1 %v2448_v10  ;;  %990 = vmatprep.mubr.f32.mxu1 %v2343_v0  ;;  %v1010_v10 = vlaneseq }
  0x58   :  { %v2569_v12 = vand.u32 127, %v1010_v10 }
  0x5a   :  { %vm1037_vm1 = vcmp.lt.s32.totalorder %v2569_v12, 16  ;;  %vm1063_vm2 = vcmp.lt.s32.totalorder %v2569_v12, 15  ;;  %vm1012_vm3 = vcmp.lt.s32.totalorder %v2569_v12, 17  ;;  %vm1089_vm4 = vcmp.lt.s32.totalorder %v2569_v12, 1 }
  0x5b   :  { %vm1128_vm5 = vcmp.lt.s32.totalorder %v2569_v12, 127  ;;  %vm1154_vm6 = vcmp.lt.s32.totalorder %v2569_v12, 113  ;;  %vm1180_vm7 = vcmp.lt.s32.totalorder %v2569_v12, 112  ;;  %vm1206_vm8 = vcmp.lt.s32.totalorder %v2569_v12, 111 }
  0x5c   :  { %527 = vmatmul.mubr.f32.vlgmr.msra.gmra.mrb[0].mxu0 %v2458_v14  ;;  %992 = vmatmul.mubr.f32.vlgmr.msra.gmra.mrb[0].mxu1 %v2458_v14 }
  0x5d   :  { %1314 = vmatprep.mubr.f32.mxu0 %v2343_v0  ;;  %1779 = vmatprep.mubr.f32.mxu1 %v2343_v0 }
  0xaa   :  { %v62_v34 = vpop.permute.xlu0 %61 }
 0x12f   :  { %v528_v35 = vpop.f32.mrb[0].mxu0  ;;  %v993_v36 = vpop.f32.mrb[0].mxu1 }
 0x130   :  { %v2202_v37 = vadd.f32 %v528_v35, %v62_v34  ;;  %v2204_v38 = vadd.f32 %v993_v36, %v62_v34  ;;  %v530_v39 = vpop.f32.mrb[1].mxu0  ;;  %v995_v40 = vpop.f32.mrb[1].mxu1  ;;  %v1071_v36 = vld [vmem:[#allocation5 + $0x50] sm:$0xff] }
 0x131   :  { %v2205_v43 = vadd.f32 %v995_v40, %v62_v34  ;;  %v2203_v44 = vadd.f32 %v530_v39, %v62_v34  ;;  %v1017_v34 = vld [vmem:[#allocation5] sm:$0xff] }
 0x132   :  { %v2495_v41 = vmax.f32 %v2202_v37, 0.0  ;;  %v2497_v42 = vmax.f32 %v2204_v38, 0.0  ;;  %v1069_v39 = vld [vmem:[#allocation5 + $0x40] sm:$0xff] }
 0x133   :  { %v2506_v45 = vmax.f32 %v2205_v43, 0.0  ;;  %v2511_v46 = vmax.f32 %v2203_v44, 0.0  ;;  %v1096_v43 = vld [vmem:[#allocation5 + $0x68] sm:$0xff] }
 0x134   :  { %1006 = vrot.lane.b32.xlu1 %v2497_v42, %s2345_s1  ;;  %1002 = vrot.lane.b32.xlu0 %v2495_v41, %s2345_s1 }
 0x138   :  { %1029 = vrot.lane.b32.xlu1 %v2495_v41, %s2346_s2  ;;  %1198 = vrot.lane.b32.xlu0 %v2495_v41, %s2347_s29 }
 0x13c   :  { %1033 = vrot.lane.b32.xlu1 %v2497_v42, %s2346_s2  ;;  %1008 = vrot.lane.b32.xlu0 %v2506_v45, %s2345_s1 }
 0x140   :  { %1055 = vrot.lane.b32.xlu1 %v2495_v41, %s2348_s30  ;;  %1031 = vrot.lane.b32.xlu0 %v2511_v46, %s2346_s2 }
 0x144   :  { %1059 = vrot.lane.b32.xlu1 %v2497_v42, %s2348_s30  ;;  %1035 = vrot.lane.b32.xlu0 %v2506_v45, %s2346_s2 }
 0x148   :  { %1081 = vrot.lane.b32.xlu1 %v2495_v41, %s2349_s8  ;;  %1057 = vrot.lane.b32.xlu0 %v2511_v46, %s2348_s30 }
 0x14c   :  { %1085 = vrot.lane.b32.xlu1 %v2497_v42, %s2349_s8  ;;  %1061 = vrot.lane.b32.xlu0 %v2506_v45, %s2348_s30 }
 0x150   :  { %1120 = vrot.lane.b32.xlu1 %v2495_v41, %s2350_s9  ;;  %1083 = vrot.lane.b32.xlu0 %v2511_v46, %s2349_s8 }
 0x154   :  { %1124 = vrot.lane.b32.xlu1 %v2497_v42, %s2350_s9  ;;  %1087 = vrot.lane.b32.xlu0 %v2506_v45, %s2349_s8 }
 0x158   :  { %1146 = vrot.lane.b32.xlu1 %v2495_v41, %s2351_s10  ;;  %1122 = vrot.lane.b32.xlu0 %v2511_v46, %s2350_s9 }
 0x15c   :  { %1150 = vrot.lane.b32.xlu1 %v2497_v42, %s2351_s10  ;;  %1126 = vrot.lane.b32.xlu0 %v2506_v45, %s2350_s9 }
 0x160   :  { %1172 = vrot.lane.b32.xlu1 %v2495_v41, %s2352_s11  ;;  %1148 = vrot.lane.b32.xlu0 %v2511_v46, %s2351_s10 }
 0x164   :  { %1004 = vrot.lane.b32.xlu1 %v2511_v46, %s2345_s1  ;;  %1152 = vrot.lane.b32.xlu0 %v2506_v45, %s2351_s10 }
 0x168   :  { %1176 = vrot.lane.b32.xlu1 %v2497_v42, %s2352_s11  ;;  %1174 = vrot.lane.b32.xlu0 %v2511_v46, %s2352_s11 }
 0x16c   :  { %1227 = vperm.xlu1 %2266, %v1224_v47   ;;  %1178 = vrot.lane.b32.xlu0 %v2506_v45, %s2352_s11 }
 0x170   :  { %1200 = vrot.lane.b32.xlu1 %v2511_v46, %s2347_s29  ;;  %1202 = vrot.lane.b32.xlu0 %v2497_v42, %s2347_s29 }
 0x174   :  { %1204 = vrot.lane.b32.xlu1 %v2506_v45, %s2347_s29  ;;  %1242 = vperm.xlu0 %2265, %v1239_v48   ;;  %v1046_v48 = vld [vmem:[#allocation5 + $0x38] sm:$0xff] }
 0x1a6   :  { %v2549_v49 = vpop.permute.xlu1 %1006  ;;  %v1003_v50 = vpop.permute.xlu0 %1002 }
 0x1aa   :  { %v1030_v51 = vpop.permute.xlu1 %1029  ;;  %v2551_v52 = vpop.permute.xlu0 %1198 }
 0x1ae   :  { %v1034_v53 = vpop.permute.xlu1 %1033  ;;  %v1009_v54 = vpop.permute.xlu0 %1008 }
 0x1af   :  { %v1016_v35 = vsel %vm1012_vm3, %v1009_v54, %v1003_v50 }
 0x1b2   :  { %v1056_v55 = vpop.permute.xlu1 %1055  ;;  %v1032_v56 = vpop.permute.xlu0 %1031 }
 0x1b3   :  { %v1040_v16 = vsel %vm1037_vm1, %v1030_v51, %v1032_v56  ;;  %v1039_v21 = vsel %vm1037_vm1, %v1032_v56, %v1034_v53 }
 0x1b4   :  { %v1048_v25 = vmul.f32 %v1044_v15, %v1040_v16  ;;  %v1049_v30 = vmul.f32 %v1045_v20, %v1039_v21  ;;  %v1021_v15 = vmul.f32 %v1017_v34, %v1016_v35  ;;  %v1097_v21 = vld [vmem:[#allocation5 + $0x70] sm:$0xff] }
 0x1b6   :  { %v2553_v57 = vpop.permute.xlu1 %1059  ;;  %v1036_v58 = vpop.permute.xlu0 %1035 }
 0x1b7   :  { %v1041_v32 = vsel %vm1037_vm1, %v1036_v58, %v1030_v51  ;;  %v1038_v51 = vsel %vm1037_vm1, %v1034_v53, %v1036_v58  ;;  %v1020_v53 = vld [vmem:[#allocation5 + $0x18] sm:$0xff] }
 0x1b8   :  { %v1072_v58 = vld [vmem:[#allocation5 + $0x58] sm:$0xff] }
 0x1ba   :  { %v1082_v59 = vpop.permute.xlu1 %1081  ;;  %v1058_v60 = vpop.permute.xlu0 %1057 }
 0x1bb   :  { %v1066_v27 = vsel %vm1063_vm2, %v1056_v55, %v1058_v60  ;;  %v1065_v37 = vsel %vm1063_vm2, %v1058_v60, %v2553_v57  ;;  %v1238_v60 = vld [vmem:[%s2738_s5] sm:$0xff]  ;;  %s2353_s5 = smov [#allocation7]  }
 0x1bc   :  { %v1074_v38 = vmul.f32 %v1070_v26, %v1066_v27  ;;  %v1075_v16 = vmul.f32 %v1071_v36, %v1065_v37  ;;  %s2192_s16 = sshll.u32 %s2353_s5, 4  ;;  %s2193_s16 = int_to_ptr.vmem [resolvable:$true] %s2192_s16 }
 0x1bd   :  { %s2311_s17 = scalar_lea.vmem %s2193_s16, 512  ;;  %p2316_p3 = scmp.lt.s32.totalorder %s2193_s16, %s2193_s16 }
 0x1be   :  { %v2555_v61 = vpop.permute.xlu1 %1085  ;;  %v1062_v62 = vpop.permute.xlu0 %1061  ;;  %p2312_p2 = scmp.ne.s32.totalorder %s2193_s16, %s2311_s17  ;;  %p2317_p4 = scmp.lt.s32.totalorder %s2311_s17, %s2311_s17 }
 0x1bf   :  { %v1067_v40 = vsel %vm1063_vm2, %v1062_v62, %v1056_v55  ;;  %v1013_v55 = vsel %vm1012_vm3, %v2549_v49, %v1009_v54  ;;  %v1050_v54 = vmul.f32 %v1046_v48, %v1038_v51  ;;  %v1111_v51 = vld [vmem:[#allocation5 + $0x98] sm:$0xff] }
 0x1c0   :  { %v1073_v20 = vmul.f32 %v1069_v39, %v1067_v40  ;;  %p2318_p5 = por %p2317_p4, %p2316_p3 }
 0x1c2   :  { %v2557_v63 = vpop.permute.xlu1 %1120  ;;  %v1084_v1 = vpop.permute.xlu0 %1083  ;;  %p2319_p6 = pnand %p2318_p5, %p2312_p2 }
 0x1c3   :  { %v1092_v44 = vsel %vm1089_vm4, %v1082_v59, %v1084_v1 }
 0x1c6   :  { %v2559_v5 = vpop.permute.xlu1 %1124  ;;  %v2561_v6 = vpop.permute.xlu0 %1087 }
 0x1c7   :  { %v1090_v27 = vsel %vm1089_vm4, %v2555_v61, %v2561_v6 }
 0x1ca   :  { %v2563_v7 = vpop.permute.xlu1 %1146  ;;  %v2565_v9 = vpop.permute.xlu0 %1122 }
 0x1cb   :  { %v1131_v48 = vsel %vm1128_vm5, %v2557_v63, %v2565_v9 }
 0x1ce   :  { %v2567_v11 = vpop.permute.xlu1 %1150  ;;  %v2571_v13 = vpop.permute.xlu0 %1126 }
 0x1d2   :  { %v2574_v14 = vpop.permute.xlu1 %1172  ;;  %v2582_v22 = vpop.permute.xlu0 %1148 }
 0x1d6   :  { %v1005_v19 = vpop.permute.xlu1 %1004  ;;  %v2605_v10 = vpop.permute.xlu0 %1152 }
 0x1d7   :  { %v1014_v23 = vsel %vm1012_vm3, %v1005_v19, %v2549_v49  ;;  %v1015_v24 = vsel %vm1012_vm3, %v1003_v50, %v1005_v19  ;;  %v1047_v50 = vmul.f32 %v1043_v31, %v1041_v32  ;;  %v1064_v19 = vsel %vm1063_vm2, %v2553_v57, %v1062_v62  ;;  %v1108_v32 = vld [vmem:[#allocation5 + $0x80] sm:$0xff] }
 0x1d8   :  { %v1022_v28 = vmul.f32 %v1018_v17, %v1015_v24  ;;  %v1023_v29 = vmul.f32 %v1019_v18, %v1014_v23  ;;  %v1095_v17 = vld [vmem:[#allocation5 + $0x60] sm:$0xff]  ;;  %v1093_v18 = vsel %vm1089_vm4, %v2561_v6, %v1082_v59  ;;  %v1091_v23 = vsel %vm1089_vm4, %v1084_v1, %v2555_v61  ;;  %v1098_v59 = vld [vmem:[#allocation5 + $0x78] sm:$0xff] }
 0x1d9   :  { %v1100_v49 = vmul.f32 %v1096_v43, %v1092_v44  ;;  %v1051_v26 = vadd.f32 %v1047_v50, %v1021_v15  ;;  %v1099_v57 = vmul.f32 %v1095_v17, %v1093_v18  ;;  %v1101_v1 = vmul.f32 %v1097_v21, %v1091_v23  ;;  %v1160_v17 = vld [vmem:[#allocation5 + $0xc0] sm:$0xff]  ;;  %v1161_v18 = vld [vmem:[#allocation5 + $0xc8] sm:$0xff] }
 0x1da   :  { %v1052_v33 = vadd.f32 %v1048_v25, %v1022_v28  ;;  %v1053_v47 = vadd.f32 %v1049_v30, %v1023_v29  ;;  %v1109_v25 = vld [vmem:[#allocation5 + $0x88] sm:$0xff]  ;;  %v1246_v28 = vsel %vm64_vm0, %v1238_v60, 0  ;;  %v1024_v29 = vmul.f32 %v1020_v53, %v1013_v55  ;;  %v1175_v35 = vpop.permute.xlu0 %1174  ;;  %v1136_v60 = vld [vmem:[#allocation5 + $0xb0] sm:$0xff]  ;;  %v1137_v55 = vld [vmem:[#allocation5 + $0xb8] sm:$0xff] }
 0x1db   :  { %v1076_v30 = vmul.f32 %v1072_v58, %v1064_v19  ;;  %v1077_v31 = vadd.f32 %v1073_v20, %v1051_v26  ;;  %v1113_v34 = vmul.f32 %v1109_v25, %v2511_v46  ;;  %v1102_v37 = vmul.f32 %v1098_v59, %v1090_v27  ;;  %v1163_v59 = vld [vmem:[#allocation5 + $0xd8] sm:$0xff] }
 0x1dc   :  { %v1078_v56 = vadd.f32 %v1074_v38, %v1052_v33  ;;  %v1079_v24 = vadd.f32 %v1075_v16, %v1053_v47  ;;  %v1110_v33 = vld [vmem:[#allocation5 + $0x90] sm:$0xff]  ;;  %v1054_v36 = vadd.f32 %v1050_v54, %v1024_v29  ;;  %v1135_v38 = vld [vmem:[#allocation5 + $0xa8] sm:$0xff]  ;;  %v1130_v61 = vsel %vm1128_vm5, %v2565_v9, %v2559_v5  ;;  %v1134_v47 = vld [vmem:[#allocation5 + $0xa0] sm:$0xff]  ;;  %v1177_v16 = vpop.permute.xlu1 %1176 }
 0x1dd   :  { %v2633_v39 = vand.u32 4294901760, %v1246_v28  ;;  %v1103_v40 = vadd.f32 %v1099_v57, %v1077_v31  ;;  %v1112_v46 = vmul.f32 %v1108_v32, %v2495_v41  ;;  %v1114_v50 = vmul.f32 %v1110_v33, %v2497_v42  ;;  %v1189_v33 = vld [vmem:[#allocation5 + $0xf8] sm:$0xff] }
 0x1de   :  { %v1104_v62 = vadd.f32 %v1100_v49, %v1078_v56  ;;  %v1105_v6 = vadd.f32 %v1101_v1, %v1079_v24  ;;  %v1080_v44 = vadd.f32 %v1076_v30, %v1054_v36  ;;  %v1139_v56 = vmul.f32 %v1135_v38, %v1130_v61  ;;  %v1179_v20 = vpop.permute.xlu0 %1178  ;;  %v1186_v49 = vld [vmem:[#allocation5 + $0xe0] sm:$0xff]  ;;  %v1187_v30 = vld [vmem:[#allocation5 + $0xe8] sm:$0xff] }
 0x1df   :  { %v1129_v15 = vsel %vm1128_vm5, %v2559_v5, %v2571_v13  ;;  %v1132_v41 = vsel %vm1128_vm5, %v2571_v13, %v2557_v63  ;;  %v1156_v42 = vsel %vm1154_vm6, %v2582_v22, %v2567_v11  ;;  %v1157_v5 = vsel %vm1154_vm6, %v2563_v7, %v2582_v22  ;;  %v1162_v22 = vld [vmem:[#allocation5 + $0xd0] sm:$0xff] }
 0x1e0   :  { %v1117_v43 = vadd.f32 %v1113_v34, %v1104_v62  ;;  %v1106_v9 = vadd.f32 %v1102_v37, %v1080_v44  ;;  %v1118_v53 = vadd.f32 %v1114_v50, %v1105_v6  ;;  %v1116_v58 = vadd.f32 %v1112_v46, %v1103_v40  ;;  %v1188_v6 = vld [vmem:[#allocation5 + $0xf0] sm:$0xff] }
 0x1e1   :  { %v1138_v19 = vmul.f32 %v1134_v47, %v1131_v48  ;;  %v1115_v63 = vmul.f32 %v1111_v51, %v2506_v45  ;;  %v1140_v21 = vmul.f32 %v1136_v60, %v1129_v15  ;;  %v1141_v23 = vmul.f32 %v1137_v55, %v1132_v41  ;;  %v1214_v41 = vld [vmem:[#allocation5 + $0x110] sm:$0xff] }
 0x1e2   :  { %v1143_v13 = vadd.f32 %v1139_v56, %v1117_v43  ;;  %v1183_v54 = vsel %vm1180_vm7, %v2574_v14, %v1175_v35  ;;  %v2664_v24 = vsub.f32 %v1246_v28, %v2633_v39  ;;  %v1164_v25 = vmul.f32 %v1160_v17, %v1157_v5  ;;  %v1203_v43 = vpop.permute.xlu0 %1202 }
 0x1e3   :  { %v1165_v26 = vmul.f32 %v1161_v18, %v1156_v42  ;;  %v1155_v45 = vsel %vm1154_vm6, %v2567_v11, %v2605_v10  ;;  %v1158_v27 = vsel %vm1154_vm6, %v2605_v10, %v2563_v7  ;;  %v1119_v62 = vadd.f32 %v1115_v63, %v1106_v9  ;;  %v1212_v7 = vld [vmem:[#allocation5 + $0x100] sm:$0xff]  ;;  %v1213_v10 = vld [vmem:[#allocation5 + $0x108] sm:$0xff]  ;;  %v1215_v9 = vld [vmem:[#allocation5 + $0x118] sm:$0xff] }
 0x1e4   :  { %v1144_v29 = vadd.f32 %v1140_v21, %v1118_v53  ;;  %v1182_v28 = vsel %vm1180_vm7, %v1175_v35, %v1177_v16  ;;  %v1142_v1 = vadd.f32 %v1138_v19, %v1116_v58  ;;  %v1190_v32 = vmul.f32 %v1186_v49, %v1183_v54 }
 0x1e5   :  { %v1169_v31 = vadd.f32 %v1165_v26, %v1143_v13  ;;  %v1184_v11 = vsel %vm1180_vm7, %v1179_v20, %v2574_v14  ;;  %v1166_v34 = vmul.f32 %v1162_v22, %v1155_v45  ;;  %v1167_v36 = vmul.f32 %v1163_v59, %v1158_v27 }
 0x1e6   :  { %v2681_v37 = vand.u32 4294901760, %v2664_v24  ;;  %v1145_v38 = vadd.f32 %v1141_v23, %v1119_v62  ;;  %v1168_v61 = vadd.f32 %v1164_v25, %v1142_v1  ;;  %v1191_v35 = vmul.f32 %v1187_v30, %v1182_v28 }
 0x1e7   :  { %v1181_v40 = vsel %vm1180_vm7, %v1177_v16, %v1179_v20  ;;  %v1170_v47 = vadd.f32 %v1166_v34, %v1144_v29  ;;  %v1193_v46 = vmul.f32 %v1189_v33, %v1184_v11 }
 0x1e8   :  { %v1194_v51 = vadd.f32 %v1190_v32, %v1168_v61  ;;  %v1195_v50 = vadd.f32 %v1191_v35, %v1169_v31  ;;  %v1171_v55 = vadd.f32 %v1167_v36, %v1145_v38  ;;  %v1192_v15 = vmul.f32 %v1188_v6, %v1181_v40 }
 0x1e9   :  { %v1318_v42 = vsub.f32 %v2664_v24, %v2681_v37 }
 0x1ea   :  { %v1196_v5 = vadd.f32 %v1192_v15, %v1170_v47  ;;  %v1197_v53 = vadd.f32 %v1193_v46, %v1171_v55 }
 0x1eb   :  { %v1228_v57 = vpop.permute.xlu1 %1227  ;;  %v1319_v26 = vand.u32 4294901760, %v1318_v42 }
 0x1ef   :  { %v1201_v44 = vpop.permute.xlu1 %1200 }
 0x1f0   :  { %v1208_v14 = vsel %vm1206_vm8, %v1201_v44, %v1203_v43  ;;  %v1209_v48 = vsel %vm1206_vm8, %v2551_v52, %v1201_v44 }
 0x1f1   :  { %v1216_v56 = vmul.f32 %v1212_v7, %v1209_v48  ;;  %v1217_v60 = vmul.f32 %v1213_v10, %v1208_v14 }
 0x1f3   :  { %v1220_v16 = vadd.f32 %v1216_v56, %v1194_v51  ;;  %v1221_v17 = vadd.f32 %v1217_v60, %v1195_v50  ;;  %v1205_v18 = vpop.permute.xlu1 %1204 }
 0x1f4   :  { %v1207_v58 = vsel %vm1206_vm8, %v1203_v43, %v1205_v18  ;;  %v1210_v19 = vsel %vm1206_vm8, %v1205_v18, %v2551_v52 }
 0x1f5   :  { %v1230_v63 = vadd.f32 %v1228_v57, %v1220_v16  ;;  %v1231_v13 = vadd.f32 %v1228_v57, %v1221_v17  ;;  %v1218_v20 = vmul.f32 %v1214_v41, %v1207_v58  ;;  %v1219_v21 = vmul.f32 %v1215_v9, %v1210_v19 }
 0x1f7   :  { %v1234_v23 = vmax.f32 %v1230_v63, 0.0  ;;  %v1235_v49 = vmax.f32 %v1231_v13, 0.0  ;;  %v1222_v54 = vadd.f32 %v1218_v20, %v1196_v5  ;;  %v1223_v25 = vadd.f32 %v1219_v21, %v1197_v53 }
 0x1f9   :  { %v1232_v22 = vadd.f32 %v1228_v57, %v1222_v54  ;;  %v1233_v59 = vadd.f32 %v1228_v57, %v1223_v25  ;;  %v1248_v45 = vand.u32 4294901760, %v1235_v49  ;;  %v1250_v27 = vand.u32 4294901760, %v1234_v23 }
 0x1fb   :  { %v1236_v62 = vmax.f32 %v1232_v22, 0.0  ;;  %v1237_v29 = vmax.f32 %v1233_v59, 0.0  ;;  %1249 = vmatprep.subr.mxu0 %v1248_v45  ;;  %v1327_v30 = vsub.f32 %v1235_v49, %v1248_v45  ;;  %v1333_v28 = vsub.f32 %v1234_v23, %v1250_v27 }
 0x1fc   :  { %1251 = vmatpush1.msra.mxu0 %v1250_v27 }
 0x1fd   :  { %1320 = vmatmul.mubr.f32.vlgmr.msra.gmra.mrb[2].mxu0 %v1319_v26  ;;  %v1713_v52 = vand.u32 4294901760, %v1237_v29  ;;  %v1715_v12 = vand.u32 4294901760, %v1236_v62  ;;  %v1328_v1 = vand.u32 4294901760, %v1327_v30  ;;  %v1334_v31 = vand.u32 4294901760, %v1333_v28 }
 0x1fe   :  { %1400 = vmatprep.mubr.f32.mxu0 %v2343_v0 }
 0x1ff   :  { %1714 = vmatprep.subr.mxu1 %v1713_v52  ;;  %v1329_v32 = vsub.f32 %v1327_v30, %v1328_v1  ;;  %v1335_v33 = vsub.f32 %v1333_v28, %v1334_v31  ;;  %v1792_v11 = vsub.f32 %v1237_v29, %v1713_v52  ;;  %v1798_v57 = vsub.f32 %v1236_v62, %v1715_v12 }
 0x200   :  { %1716 = vmatpush1.msra.mxu1 %v1715_v12 }
 0x201   :  { %1785 = vmatmul.mubr.f32.vlgmr.msra.gmra.mrb[2].mxu1 %v1319_v26  ;;  %v1330_v34 = vand.u32 4294901760, %v1329_v32  ;;  %v1336_v36 = vand.u32 4294901760, %v1335_v33  ;;  %v1793_v7 = vand.u32 4294901760, %v1792_v11  ;;  %v1799_v10 = vand.u32 4294901760, %v1798_v57 }
 0x202   :  { %1865 = vmatprep.mubr.f32.mxu1 %v2343_v0 }
 0x203   :  { %1331 = vmatprep.subr.mxu0 %v1330_v34  ;;  %v1794_v38 = vsub.f32 %v1792_v11, %v1793_v7  ;;  %v1800_v61 = vsub.f32 %v1798_v57, %v1799_v10 }
 0x204   :  { %1337 = vmatpush1.msra.mxu0 %v1336_v36 }
 0x205   :  { %1402 = vmatmul.mubr.f32.vlgmr.msra.gmra.mrb[2].mxu0 %v2633_v39  ;;  %1410 = vmatprep.subr.mxu0 %v1327_v30  ;;  %v1795_v35 = vand.u32 4294901760, %v1794_v38  ;;  %v1801_v6 = vand.u32 4294901760, %v1800_v61 }
 0x206   :  { %1413 = vmatpush1.msra.mxu0 %v1333_v28  ;;  %1476 = vmatprep.mubr.f32.mxu0 %v2343_v0 }
 0x207   :  { %1486 = vmatprep.subr.mxu0 %v1248_v45  ;;  %1796 = vmatprep.subr.mxu1 %v1795_v35 }
 0x208   :  { %1802 = vmatpush1.msra.mxu1 %v1801_v6 }
 0x209   :  { %1867 = vmatmul.mubr.f32.vlgmr.msra.gmra.mrb[2].mxu1 %v2633_v39  ;;  %1875 = vmatprep.subr.mxu1 %v1792_v11 }
 0x20a   :  { %1878 = vmatpush1.msra.mxu1 %v1798_v57  ;;  %1941 = vmatprep.mubr.f32.mxu1 %v2343_v0 }
 0x20b   :  { %1951 = vmatprep.subr.mxu1 %v1713_v52 }
 0x20d   :  { %1479 = vmatmul.mubr.f32.vlgmr.msra.gmra.mrb[2].mxu0 %v2664_v24 }
 0x20e   :  { %1488 = vmatpush1.msra.mxu0 %v1250_v27  ;;  %1551 = vmatprep.mubr.f32.mxu0 %v2343_v0 }
 0x20f   :  { %1564 = vmatprep.subr.mxu0 %v1328_v1 }
 0x211   :  { %1944 = vmatmul.mubr.f32.vlgmr.msra.gmra.mrb[2].mxu1 %v2664_v24  ;;  %v1243_v24 = vpop.permute.xlu0 %1242 }
 0x212   :  { %1953 = vmatpush1.msra.mxu1 %v1715_v12  ;;  %2016 = vmatprep.mubr.f32.mxu1 %v2343_v0 }
 0x213   :  { %2029 = vmatprep.subr.mxu1 %v1793_v7 }
 0x215   :  { %1555 = vmatmul.mubr.f32.vlgmr.msra.gmra.mrb[2].mxu0 %v2681_v37 }
 0x216   :  { %1568 = vmatpush1.msra.mxu0 %v1334_v31  ;;  %1631 = vmatprep.mubr.f32.mxu0 %v2343_v0 }
 0x217   :  { %1640 = vmatprep.subr.mxu0 %v1248_v45 }
 0x219   :  { %2020 = vmatmul.mubr.f32.vlgmr.msra.gmra.mrb[2].mxu1 %v2681_v37 }
 0x21a   :  { %2033 = vmatpush1.msra.mxu1 %v1799_v10  ;;  %2096 = vmatprep.mubr.f32.mxu1 %v2343_v0 }
 0x21b   :  { %2105 = vmatprep.subr.mxu1 %v1713_v52 }
 0x21d   :  { %1633 = vmatmul.mubr.f32.vlgmr.msra.gmra.mrb[2].mxu0 %v2633_v39 }
 0x21e   :  { %1642 = vmatpush1.msra.mxu0 %v1250_v27  ;;  %1705 = vmatprep.mubr.f32.mxu0 %v2343_v0 }
 0x221   :  { %2098 = vmatmul.mubr.f32.vlgmr.msra.gmra.mrb[2].mxu1 %v2633_v39 }
 0x222   :  { %2107 = vmatpush1.msra.mxu1 %v1715_v12  ;;  %2170 = vmatprep.mubr.f32.mxu1 %v2343_v0 }
 0x225   :  { %1707 = vmatmul.mubr.f32.vlgmr.msra.gmra.mrb[2].mxu0 %v2633_v39 }
 0x229   :  { %2172 = vmatmul.mubr.f32.vlgmr.msra.gmra.mrb[2].mxu1 %v2633_v39 }
 0x2f8   :  { %v1708_v37 = vpop.f32.mrb[2].mxu0 }
 0x2f9   :  { %v2206_v40 = vadd.f32 %v1708_v37, %v1243_v24  ;;  %v1710_v43 = vpop.f32.mrb[3].mxu0 }
 0x2fa   :  { %v2207_v44 = vadd.f32 %v1710_v43, %v1243_v24 }
 0x2fb   :  { %v2178_v47 = vadd.f32 %v2206_v40, %v2431_v4 }
 0x2fc   :  { %v2179_v46 = vadd.f32 %v2207_v44, %v2427_v2  ;;  %v2173_v14 = vpop.f32.mrb[2].mxu1 }
 0x2fd   :  { %2182 = vst [vmem:[#allocation7] sm:$0xff] %v2178_v47  ;;  %v2208_v48 = vadd.f32 %v2173_v14, %v1243_v24  ;;  %v2175_v51 = vpop.f32.mrb[3].mxu1 }
 0x2fe   :  { %2183 = vst [vmem:[#allocation7 + $0x8] sm:$0xff] %v2179_v46  ;;  %v2209_v0 = vadd.f32 %v2175_v51, %v1243_v24 }
 0x2ff   :  { %v2180_v50 = vadd.f32 %v2208_v48, %v2442_v8 }
 0x300   :  { %v2181_v39 = vadd.f32 %v2209_v0, %v2429_v3 }
 0x301   :  { %2184 = vst [vmem:[#allocation7 + $0x10] sm:$0xff] %v2180_v50 }
 0x302   :  { %2185 = vst [vmem:[#allocation7 + $0x18] sm:$0xff] %v2181_v39 }
 0x303   :  { %2322 = shalt.err (!%p2319_p6)
}
 0x304   :  { %s2323_s20 = scalar_lea.hbm %s2740_s7, 512 }
 0x305   :  { %p2324_p7 = scmp.ne.s32.totalorder %s2740_s7, %s2323_s20  ;;  %p2327_p8 = scmp.lt.u32.totalorder %s2323_s20, %s2740_s7 }
 0x307   :  { %p2329_p9 = pnand %p2327_p8, %p2324_p7 }
 0x309   :  { %2332 = shalt.err (!%p2329_p9)
}
 0x30a   :  { %2195 = dma.vmem_to_hbm [thread:$0]  %s2193_s16, 512, %s2740_s7, [#allocation4]  }
 0x30b   :  { %2337 = dma.done.wait [#allocation4], 512  }
 0x30c   :  { %2338 = vsyncadd [#allocation4], 4294966784 }
 0x30d   :  { %2199 = vsyncpa [#allocation3], 1 }
 0x30e   :  { %2200 = vsyncpa [#allocation6], 1 }
 0x30f   :  { %2201 = vsyncpa [#allocation4], 1 }

</bundles_post_ra>
